<compile_context>
chip_gen: v5e
topology: v5e:2x2
jax: 0.10.0
libtpu: 0.0.40
codegen_flags: <defaults>
</compile_context>

<pallas_src>
import functools

import jax
import jax.numpy as jnp
from jax.experimental import pallas as pl
from jax.experimental.pallas import tpu as pltpu


# ----------------------------- Pallas kernel --------------------------------

def _conv_matmul_kernel(w_ref, b_ref, x_ref, o_ref):
    """One (batch, lane-tile) grid step:  O = W @ X + bias  (f32 MXU accumulation).

    w_ref: (Cout, KKC)     VMEM-resident weights
    b_ref: (Cout, 1)       VMEM-resident bias
    x_ref: (1, KKC, tm)    patch columns for this batch / lane tile
    o_ref: (1, Cout, tm)
    """
    acc = jnp.dot(w_ref[...], x_ref[0], preferred_element_type=jnp.float32)
    o_ref[0] = (acc + b_ref[...]).astype(o_ref.dtype)


# ----------------------------- tiling helpers --------------------------------

def _round_down(x, m):
    return (x // m) * m


def _pick_tile(M, KKC, Cout, x_bytes, o_bytes, B,
               vmem_budget_bytes=20 * 1024 * 1024):
    """Lane-tile size from a VMEM budget that is safe on v5e/v6e/v7x.

    Per-step live bytes ~= 2 * (KKC*x_bytes + Cout*o_bytes) * tm  (double-buffered
    X + O blocks); weights/bias are tiny and resident.  No divisor requirement:
    the grid uses pl.cdiv and the last block may be partial.
    """
    if M <= 128:
        return M                                   # single block == full lane dim
    per_lane = 2 * (KKC * x_bytes + Cout * o_bytes)
    tm = max(128, min(8192, vmem_budget_bytes // per_lane))
    tm = max(128, _round_down(tm, 128))
    tm = min(tm, _round_down(M, 128))
    if B == 1 and M >= 256:
        # keep >= 2 lane tiles so the parallel grid can shard across the two
        # TensorCores of a v7x chip even without a batch axis.
        tm = min(tm, max(128, _round_down(M // 2, 128)))
    return tm


def _proj_matmul(w_mat, bias_col, cols, out_dtype):
    """Y[b] = w_mat @ cols[b] + bias.  cols: (B, KKC, M) -> (B, Cout, M)."""
    B, KKC, M = cols.shape
    Cout = w_mat.shape[0]
    x_bytes = jnp.dtype(cols.dtype).itemsize
    o_bytes = jnp.dtype(out_dtype).itemsize
    tm = _pick_tile(M, KKC, Cout, x_bytes, o_bytes, B)
    grid = (B, pl.cdiv(M, tm))

    return pl.pallas_call(
        _conv_matmul_kernel,
        out_shape=jax.ShapeDtypeStruct((B, Cout, M), out_dtype),
        grid=grid,
        in_specs=[
            pl.BlockSpec((Cout, KKC), lambda b, i: (0, 0)),      # weights (resident)
            pl.BlockSpec((Cout, 1), lambda b, i: (0, 0)),        # bias (resident)
            pl.BlockSpec((1, KKC, tm), lambda b, i: (b, 0, i)),  # patch columns
        ],
        out_specs=pl.BlockSpec((1, Cout, tm), lambda b, i: (b, 0, i)),
        compiler_params=pltpu.CompilerParams(
            dimension_semantics=("parallel", "parallel"),
            vmem_limit_bytes=48 * 1024 * 1024,   # > v5e 16 MiB default, < v7x 64 MiB physical
        ),
    )(w_mat, bias_col, cols)


# ------------------------------ wrapper --------------------------------------

def _im2col(x, K, S, P):
    """x: (B, Cin, H, W) -> patch columns (B, Cin*K*K, Ho*Wo).

    Row order matches PyTorch's Conv2d OIHW weight flatten (c, ki, kj);
    column order is (oh, ow).  Pure layout plumbing (XLA), single pass.
    """
    B, C, H, W = x.shape
    if P > 0:
        x = jnp.pad(x, ((0, 0), (0, 0), (P, P), (P, P)), mode="reflect")
    Hp, Wp = H + 2 * P, W + 2 * P
    Ho = (Hp - K) // S + 1
    Wo = (Wp - K) // S + 1

    if K == S and P == 0 and Hp % S == 0 and Wp % S == 0:
        # non-overlapping patches: one reshape/transpose pass over the (small) input
        p = x.reshape(B, C, Ho, K, Wo, K).transpose(0, 1, 3, 5, 2, 4)   # (B,C,K,K,Ho,Wo)
        cols = p.reshape(B, C * K * K, Ho * Wo)
    else:
        # overlapping / padded windows: stack the K*K strided slices directly in
        # (c, ki, kj) order so no big transpose is needed afterwards.
        slices = [
            x[:, :, ki: ki + S * (Ho - 1) + 1: S, kj: kj + S * (Wo - 1) + 1: S]
            for ki in range(K) for kj in range(K)
        ]                                           # each (B, C, Ho, Wo)
        p = jnp.stack(slices, axis=2)               # (B, C, K*K, Ho, Wo)
        cols = p.reshape(B, C * K * K, Ho * Wo)
    return cols, Ho, Wo


def patch_embed_forward(x, params, *, patch_size, kernel_size=None,
                        compute_dtype=None):
    """PatchEmbed.forward: x (B, Cin, H, W) -> (B, embed_dim, Ho, Wo).

    compute_dtype: optional dtype (e.g. jnp.bfloat16) for the column / weight
    streams; accumulation stays f32.  Default (None) keeps the input dtype
    (bit-accurate-ish vs the f32 conv reference).
    """
    if kernel_size is None:
        kernel_size = patch_size
    K, S = kernel_size, patch_size
    P = (kernel_size - patch_size + 1) // 2

    w = params["proj_w"]                       # (Cout, Cin, K, K)
    b = params["proj_b"]                       # (Cout,)
    Cout = w.shape[0]
    B = x.shape[0]
    out_dtype = x.dtype

    cols, Ho, Wo = _im2col(x, K, S, P)         # (B, Cin*K*K, Ho*Wo)
    w_mat = w.reshape(Cout, -1)                # (Cout, Cin*K*K)
    if compute_dtype is not None:
        cols = cols.astype(compute_dtype)
        w_mat = w_mat.astype(compute_dtype)
    bias_col = b.reshape(Cout, 1).astype(jnp.float32)

    out = _proj_matmul(w_mat, bias_col, cols, out_dtype)   # (B, Cout, Ho*Wo)
    # free reshape — output is already in (B, Cout, spatial) layout, no transpose
    return out.reshape(B, Cout, Ho, Wo)


# ------------------------------ parameters ----------------------------------

def init_params(key, in_chans, embed_dim, kernel_size):
    kw, kb = jax.random.split(key)
    fan_in = in_chans * kernel_size * kernel_size
    bound = 1.0 / (fan_in ** 0.5)
    return {
        "proj_w": jax.random.uniform(kw, (embed_dim, in_chans, kernel_size, kernel_size),
                                     jnp.float32, -bound, bound),
        "proj_b": jax.random.uniform(kb, (embed_dim,), jnp.float32, -bound, bound),
    }


# ------------------------------ demo / check ---------------------------------

if __name__ == "__main__":
    key = jax.random.PRNGKey(0)

    # ---- default PatchEmbed config: kernel_size = patch_size (no padding) ----
    patch_size, in_chans, embed_dim = 4, 3, 96
    B, H, W = 2, 32, 32
    kx, kp, kx2, kp2 = jax.random.split(key, 4)

    x = jax.random.normal(kx, (B, in_chans, H, W), jnp.float32)
    params = init_params(kp, in_chans, embed_dim, patch_size)

    fwd = jax.jit(functools.partial(patch_embed_forward,
                                    patch_size=patch_size, kernel_size=None))
    out = jax.block_until_ready(fwd(x, params))
    assert out.shape == (B, embed_dim, H // patch_size, W // patch_size)
    assert out.dtype == jnp.float32

    ref = jax.lax.conv_general_dilated(
        x, params["proj_w"], window_strides=(patch_size, patch_size), padding="VALID",
        dimension_numbers=("NCHW", "OIHW", "NCHW"))
    ref = ref + params["proj_b"].reshape(1, embed_dim, 1, 1)
    assert jnp.allclose(out, ref, atol=1e-4, rtol=1e-4)

    # ---- bf16 column/weight stream (halves the dominant HBM traffic) ---------
    fwd_bf16 = jax.jit(functools.partial(patch_embed_forward,
                                         patch_size=patch_size, kernel_size=None,
                                         compute_dtype=jnp.bfloat16))
    out_bf16 = jax.block_until_ready(fwd_bf16(x, params))
    assert out_bf16.shape == ref.shape
    assert bool(jnp.all(jnp.isfinite(out_bf16)))
    assert jnp.allclose(out_bf16, ref, atol=0.15, rtol=0.1)   # bf16 inputs, f32 accumulation

    # ---- overlapping-kernel config: kernel_size != patch_size, reflect pad ----
    kernel_size2 = 7
    pad2 = (kernel_size2 - patch_size + 1) // 2        # = 2
    x2 = jax.random.normal(kx2, (B, in_chans, H, W), jnp.float32)
    params2 = init_params(kp2, in_chans, embed_dim, kernel_size2)

    fwd2 = jax.jit(functools.partial(patch_embed_forward,
                                     patch_size=patch_size, kernel_size=kernel_size2))
    out2 = jax.block_until_ready(fwd2(x2, params2))

    x2_pad = jnp.pad(x2, ((0, 0), (0, 0), (pad2, pad2), (pad2, pad2)), mode="reflect")
    ref2 = jax.lax.conv_general_dilated(
        x2_pad, params2["proj_w"], window_strides=(patch_size, patch_size), padding="VALID",
        dimension_numbers=("NCHW", "OIHW", "NCHW"))
    ref2 = ref2 + params2["proj_b"].reshape(1, embed_dim, 1, 1)
    assert out2.shape == ref2.shape
    assert jnp.allclose(out2, ref2, atol=1e-4, rtol=1e-4)

    print("KERNEL_OK")
</pallas_src>

<mosaic_0001>
module attributes {stable_mosaic.version = 11 : i64} {
  func.func @_conv_matmul_kernel(%arg0: i32, %arg1: i32, %arg2: memref<96x48xf32, #tpu.memory_space<vmem>>, %arg3: memref<96x1xf32, #tpu.memory_space<vmem>>, %arg4: memref<1x48x64xf32, #tpu.memory_space<vmem>>, %arg5: memref<1x96x64xf32, #tpu.memory_space<vmem>>) attributes {dimension_semantics = [#tpu.dimension_semantics<parallel>, #tpu.dimension_semantics<parallel>], iteration_bounds = array<i64: 2, 1>, scalar_prefetch = 0 : i64, scratch_operands = 0 : i64, tpu.core_type = #tpu.core_type<tc>, window_params = [{pipeline_mode = #tpu.pipeline_mode<synchronous>, transform_indices = @transform_0, window_bounds = array<i64: 96, 48>}, {pipeline_mode = #tpu.pipeline_mode<synchronous>, transform_indices = @transform_1, window_bounds = array<i64: 96, 1>}, {transform_indices = @transform_2, window_bounds = array<i64: 1, 48, 64>}, {transform_indices = @transform_3, window_bounds = array<i64: 1, 96, 64>}]} {
    %c0 = arith.constant 0 : index
    %c0_0 = arith.constant 0 : index
    %0 = vector.load %arg2[%c0, %c0_0] : memref<96x48xf32, #tpu.memory_space<vmem>>, vector<96x48xf32>
    %c0_1 = arith.constant 0 : index
    %c0_2 = arith.constant 0 : index
    %c0_3 = arith.constant 0 : index
    %1 = vector.load %arg4[%c0_1, %c0_2, %c0_3] : memref<1x48x64xf32, #tpu.memory_space<vmem>>, vector<1x48x64xf32>
    %2 = vector.shape_cast %1 : vector<1x48x64xf32> to vector<48x64xf32>
    %cst = arith.constant dense<0.000000e+00> : vector<96x64xf32>
    %3 = tpu.matmul %0, %2, %cst {dimension_numbers = #tpu.dot_dimension_numbers<[1], [0], [0], [1], [0, 0, 1, 1], [], []>} : vector<96x48xf32>, vector<48x64xf32>, vector<96x64xf32> -> vector<96x64xf32>
    %c0_4 = arith.constant 0 : index
    %c0_5 = arith.constant 0 : index
    %4 = vector.load %arg3[%c0_4, %c0_5] : memref<96x1xf32, #tpu.memory_space<vmem>>, vector<96x1xf32>
    %5 = vector.broadcast %4 : vector<96x1xf32> to vector<96x64xf32>
    %6 = arith.addf %3, %5 : vector<96x64xf32>
    %c0_6 = arith.constant 0 : index
    %c0_7 = arith.constant 0 : index
    %c0_8 = arith.constant 0 : index
    %7 = vector.load %arg5[%c0_6, %c0_7, %c0_8] : memref<1x96x64xf32, #tpu.memory_space<vmem>>, vector<1x96x64xf32>
    %8 = vector.shape_cast %7 : vector<1x96x64xf32> to vector<96x64xf32>
    %9 = vector.shape_cast %6 : vector<96x64xf32> to vector<1x96x64xf32>
    tpu.vector_store %arg5[%c0_6, %c0_7, %c0_8], %9 {strides = array<i32>} : memref<1x96x64xf32, #tpu.memory_space<vmem>>, vector<1x96x64xf32>,
    return
  }
  func.func @transform_0(%arg0: i32, %arg1: i32) -> (i32, i32) {
    %c0_i32 = arith.constant 0 : i32
    %c0_i32_0 = arith.constant 0 : i32
    %c0_i32_1 = arith.constant 0 : i32
    return %c0_i32, %c0_i32_0 : i32, i32
  }
  func.func @transform_1(%arg0: i32, %arg1: i32) -> (i32, i32) {
    %c0_i32 = arith.constant 0 : i32
    %c0_i32_0 = arith.constant 0 : i32
    %c0_i32_1 = arith.constant 0 : i32
    return %c0_i32, %c0_i32_0 : i32, i32
  }
  func.func @transform_2(%arg0: i32, %arg1: i32) -> (i32, i32, i32) {
    %c0_i32 = arith.constant 0 : i32
    %c0_i32_0 = arith.constant 0 : i32
    return %arg0, %c0_i32, %arg1 : i32, i32, i32
  }
  func.func @transform_3(%arg0: i32, %arg1: i32) -> (i32, i32, i32) {
    %c0_i32 = arith.constant 0 : i32
    %c0_i32_0 = arith.constant 0 : i32
    return %arg0, %c0_i32, %arg1 : i32, i32, i32
  }
}

</mosaic_0001>

<bundles_post_ra>
// kernel: patch_embed_forward.1
= control target key start
LH: loop header
LB: loop body
LE: loop exit
PB: predicated region body
PF: predicated region fallthrough
CT: control target
= control target key end

     0   :  { %s592_s12 = smov 0   ;;  %s594_s13 = smov 0   ;;  %s739_s0 = inlined_call_operand.vmem [shape: f32[96,48], index: 0, kind: input, shape index: {}]   ;;  %s740_s1 = inlined_call_operand.vmem [shape: f32[96,1], index: 1, kind: input, shape index: {}]   ;;  %s741_s2 = inlined_call_operand.vmem [shape: f32[2,48,64], index: 2, kind: input, shape index: {}]   ;;  %s742_s3 = inlined_call_operand.vmem [shape: f32[2,96,64], index: 3, kind: output, shape index: {}]  }
   0x1   :  { %s596_s14 = smov 0  }
   0x2 LB: > { %s25_s15 = sadd.s32 1, %s565_s13  ;;  %p482_p0 = scmp.ge.s32.totalorder %s569_s14, 1  ;;  %s569_s14 = sphi %s596_s14, %s13_s14   ;;  %s565_s13 = sphi %s594_s13, %s744_s13   ;;  %s561_s12 = sphi %s592_s12, %s743_s12  }
   0x3   : > { %p27_p1 = scmp.ge.s32.totalorder %s25_s15, 2  ;;  %p156_p2 = scmp.lt.s32.totalorder %s569_s14, 3 }
   0x5   : > { %s746_s15 = smov (%p27_p1, %s25_s15), 0  ;;  %p157_p3 = pnand %p482_p0, %p156_p2 }
   0x6   : > { %p186_p4 = scmp.lt.s32.totalorder (!%p157_p3), %s561_s12, 1 }
   0x7   : > { %160 = sbr.rel (%p157_p3) target bundleno = 183 (0xb7), region = 32 }
   0xc   : > { %v222_v0 = vld [vmem:[%s740_s1 + $0x10] sm:$0xff]  ;;  %v220_v1 = vld [vmem:[%s740_s1] sm:$0xff]  ;;  %v571_v2 = vmov 0   ;;  %s748_s12 = smov (!%p186_p4, %s561_s12), 1  ;;  %v223_v6 = vld [vmem:[%s740_s1 + $0x18] sm:$0xff]  ;;  %vm292_vm0 = vcmask 392192  }
   0xd   : > { %545 = vset.pattern.permute.xlu1 %v571_v2  ;;  %544 = vset.pattern.permute.xlu0 %v571_v2  ;;  %s517_s20 = smul.u32 48, %s748_s12  ;;  %v224_v3 = vld [vmem:[%s740_s1 + $0x20] sm:$0xff]  ;;  %v221_v7 = vld [vmem:[%s740_s1 + $0x8] sm:$0xff]  ;;  %v205_v13 = vld [vmem:[%s739_s0 + $0x18] sm:$0xff]  ;;  %vm382_vm1 = vcmask 523264  }
   0xe   : > { %244 = vperm.xlu1 %545, %v222_v0   ;;  %234 = vperm.xlu0 %544, %v220_v1   ;;  %v202_v12 = vld [vmem:[%s739_s0] sm:$0xff]  ;;  %v208_v14 = vld [vmem:[%s739_s0 + $0x30] sm:$0xff]  ;;  %v211_v15 = vld [vmem:[%s739_s0 + $0x48] sm:$0xff]  ;;  %s518_s22 = smul.u32 96, %s748_s12 }
   0xf   : > { %546 = vset.pattern.permute.xlu2 %v571_v2  ;;  %s193_s25 = scalar_lea.vmem %s741_s2, %s517_s20  ;;  %v227_v16 = vld [vmem:[%s740_s1 + $0x38] sm:$0xff]  ;;  %v226_v17 = vld [vmem:[%s740_s1 + $0x30] sm:$0xff]  ;;  %v225_v18 = vld [vmem:[%s740_s1 + $0x28] sm:$0xff] }
  0x10   : > { %254 = vperm.xlu2 %546, %v224_v3   ;;  %v219_v4 = vld [vmem:[%s193_s25 + $0x28] sm:$0xff]  ;;  %v218_v5 = vld [vmem:[%s193_s25 + $0x20] sm:$0xff]  ;;  %v217_v8 = vld [vmem:[%s193_s25 + $0x18] sm:$0xff] }
  0x11   : > { %339 = vmatpush.msra.mxu0 %v219_v4  ;;  %499 = vmatpush.msra.mxu1 %v219_v4  ;;  %v216_v9 = vld [vmem:[%s193_s25 + $0x10] sm:$0xff]  ;;  %v215_v10 = vld [vmem:[%s193_s25 + $0x8] sm:$0xff]  ;;  %v214_v11 = vld [vmem:[%s193_s25] sm:$0xff]  ;;  %s704_s25 = scalar_lea.vmem %s742_s3, %s518_s22 }
  0x12   : > { %500 = vmatpush.msra.mxu2 %v219_v4  ;;  %501 = vmatpush.msra.mxu3 %v219_v4  ;;  %v203_v19 = vld [vmem:[%s739_s0 + $0x8] sm:$0xff]  ;;  %v206_v20 = vld [vmem:[%s739_s0 + $0x20] sm:$0xff]  ;;  %v209_v21 = vld [vmem:[%s739_s0 + $0x38] sm:$0xff] }
  0x13   : > { %340 = vmatpush.msra.mxu0 %v218_v5  ;;  %502 = vmatpush.msra.mxu1 %v218_v5  ;;  %v212_v22 = vld [vmem:[%s739_s0 + $0x50] sm:$0xff]  ;;  %v229_v24 = vld [vmem:[%s740_s1 + $0x48] sm:$0xff]  ;;  %v228_v25 = vld [vmem:[%s740_s1 + $0x40] sm:$0xff] }
  0x14   : > { %503 = vmatpush.msra.mxu2 %v218_v5  ;;  %504 = vmatpush.msra.mxu3 %v218_v5  ;;  %v230_v23 = vld [vmem:[%s740_s1 + $0x50] sm:$0xff]  ;;  %v207_v27 = vld [vmem:[%s739_s0 + $0x28] sm:$0xff]  ;;  %v210_v28 = vld [vmem:[%s739_s0 + $0x40] sm:$0xff] }
  0x15   : > { %341 = vmatpush.msra.mxu0 %v217_v8  ;;  %505 = vmatpush.msra.mxu1 %v217_v8  ;;  %v204_v26 = vld [vmem:[%s739_s0 + $0x10] sm:$0xff]  ;;  %v213_v29 = vld [vmem:[%s739_s0 + $0x58] sm:$0xff] }
  0x16   : > { %249 = vperm.xlu1 %545, %v223_v6   ;;  %239 = vperm.xlu0 %544, %v221_v7   ;;  %v231_v30 = vld [vmem:[%s740_s1 + $0x58] sm:$0xff] }
  0x17   : > { %506 = vmatpush.msra.mxu2 %v217_v8  ;;  %507 = vmatpush.msra.mxu3 %v217_v8 }
  0x18   : > { %342 = vmatpush.msra.mxu0 %v216_v9  ;;  %508 = vmatpush.msra.mxu1 %v216_v9 }
  0x19   : > { %509 = vmatpush.msra.mxu2 %v216_v9  ;;  %510 = vmatpush.msra.mxu3 %v216_v9 }
  0x1a   : > { %343 = vmatpush.msra.mxu0 %v215_v10  ;;  %511 = vmatpush.msra.mxu1 %v215_v10 }
  0x1b   : > { %512 = vmatpush.msra.mxu2 %v215_v10  ;;  %513 = vmatpush.msra.mxu3 %v215_v10 }
  0x1c   : > { %344 = vmatpush.msra.mxu0 %v214_v11  ;;  %514 = vmatpush.msra.mxu1 %v214_v11 }
  0x1d   : > { %515 = vmatpush.msra.mxu2 %v214_v11  ;;  %516 = vmatpush.msra.mxu3 %v214_v11 }
  0x1e   : > { %485 = vmatmul.msk.f32.vlgmr.msra.gmra.mxu0 %vm292_vm0, %v202_v12  ;;  %488 = vmatmul.msk.f32.vlgmr.msra.gmra.mxu1 %vm292_vm0, %v205_v13 }
  0x1f   : > { %491 = vmatmul.msk.f32.vlgmr.msra.gmra.mxu2 %vm292_vm0, %v208_v14  ;;  %494 = vmatmul.msk.f32.vlgmr.msra.gmra.mxu3 %vm292_vm0, %v211_v15 }
  0x20   : > { %269 = vperm.xlu1 %545, %v227_v16   ;;  %264 = vperm.xlu0 %544, %v226_v17  }
  0x21   : > { %259 = vperm.xlu2 %546, %v225_v18  }
  0x26   : > { %486 = vmatmul.msk.f32.gmra.mxu0 %vm292_vm0, %v203_v19  ;;  %489 = vmatmul.msk.f32.gmra.mxu1 %vm292_vm0, %v206_v20 }
  0x27   : > { %492 = vmatmul.msk.f32.gmra.mxu2 %vm292_vm0, %v209_v21  ;;  %495 = vmatmul.msk.f32.gmra.mxu3 %vm292_vm0, %v212_v22 }
  0x28   : > { %284 = vperm.xlu1 %545, %v230_v23   ;;  %279 = vperm.xlu0 %544, %v229_v24  }
  0x29   : > { %274 = vperm.xlu2 %546, %v228_v25  }
  0x2e   : > { %487 = vmatmul.msk.f32.gmra.mxu0 %vm292_vm0, %v204_v26  ;;  %490 = vmatmul.msk.f32.gmra.mxu1 %vm292_vm0, %v207_v27 }
  0x2f   : > { %493 = vmatmul.msk.f32.gmra.mxu2 %vm292_vm0, %v210_v28  ;;  %496 = vmatmul.msk.f32.gmra.mxu3 %vm292_vm0, %v213_v29 }
  0x31   : > { %289 = vperm.xlu2 %546, %v231_v30  }
  0x6a   : > { %v255_v34 = vpop.permute.xlu2 %254 }
  0x7b   : > { %v260_v41 = vpop.permute.xlu2 %259 }
  0x80   : > { %v235_v31 = vpop.permute.xlu0 %234  ;;  %v245_v32 = vpop.permute.xlu1 %244 }
  0x83   : > { %v275_v52 = vpop.permute.xlu2 %274 }
  0x88   : > { %v240_v33 = vpop.permute.xlu0 %239  ;;  %v250_v35 = vpop.permute.xlu1 %249 }
  0x8b   : > { %v290_v62 = vpop.permute.xlu2 %289 }
  0x92   : > { %v265_v36 = vpop.permute.xlu0 %264  ;;  %v270_v42 = vpop.permute.xlu1 %269 }
  0x9a   : > { %v280_v43 = vpop.permute.xlu0 %279  ;;  %v285_v53 = vpop.permute.xlu1 %284 }
  0x9b   : > { %v346_v37 = vpop.f32.mrf.mxu0  ;;  %v355_v38 = vpop.f32.mrf.mxu1 }
  0x9c   : > { %v347_v39 = vadd.f32 %v346_v37, %v235_v31  ;;  %v356_v40 = vadd.f32 %v355_v38, %v250_v35 }
  0x9e   : > { %383 = vst.msk [vmem:[%s704_s25] sm:$0xff] %vm382_vm1, %v347_v39 }
  0x9f   : > { %386 = vst.msk [vmem:[%s704_s25 + $0x18] sm:$0xff] %vm382_vm1, %v356_v40 }
  0xa2   : > { %v364_v44 = vpop.f32.mrf.mxu2  ;;  %v373_v45 = vpop.f32.mrf.mxu3 }
  0xa3   : > { %v365_v46 = vadd.f32 %v364_v44, %v265_v36  ;;  %v374_v47 = vadd.f32 %v373_v45, %v280_v43  ;;  %v349_v48 = vpop.f32.mrf.mxu0  ;;  %v358_v49 = vpop.f32.mrf.mxu1 }
  0xa4   : > { %v350_v50 = vadd.f32 %v349_v48, %v240_v33  ;;  %v359_v51 = vadd.f32 %v358_v49, %v255_v34 }
  0xa5   : > { %389 = vst.msk [vmem:[%s704_s25 + $0x30] sm:$0xff] %vm382_vm1, %v365_v46 }
  0xa6   : > { %392 = vst.msk [vmem:[%s704_s25 + $0x48] sm:$0xff] %vm382_vm1, %v374_v47 }
  0xa7   : > { %384 = vst.msk [vmem:[%s704_s25 + $0x8] sm:$0xff] %vm382_vm1, %v350_v50 }
  0xa8   : > { %387 = vst.msk [vmem:[%s704_s25 + $0x20] sm:$0xff] %vm382_vm1, %v359_v51 }
  0xaa   : > { %v367_v54 = vpop.f32.mrf.mxu2  ;;  %v376_v55 = vpop.f32.mrf.mxu3 }
  0xab   : > { %v368_v56 = vadd.f32 %v367_v54, %v270_v42  ;;  %v377_v57 = vadd.f32 %v376_v55, %v285_v53  ;;  %v352_v58 = vpop.f32.mrf.mxu0  ;;  %v361_v59 = vpop.f32.mrf.mxu1 }
  0xac   : > { %v353_v60 = vadd.f32 %v352_v58, %v245_v32  ;;  %v362_v61 = vadd.f32 %v361_v59, %v260_v41 }
  0xad   : > { %390 = vst.msk [vmem:[%s704_s25 + $0x38] sm:$0xff] %vm382_vm1, %v368_v56 }
  0xae   : > { %393 = vst.msk [vmem:[%s704_s25 + $0x50] sm:$0xff] %vm382_vm1, %v377_v57 }
  0xaf   : > { %385 = vst.msk [vmem:[%s704_s25 + $0x10] sm:$0xff] %vm382_vm1, %v353_v60 }
  0xb0   : > { %388 = vst.msk [vmem:[%s704_s25 + $0x28] sm:$0xff] %vm382_vm1, %v362_v61 }
  0xb2   : > { %v370_v63 = vpop.f32.mrf.mxu2  ;;  %v379_v0 = vpop.f32.mrf.mxu3 }
  0xb3   : > { %v371_v1 = vadd.f32 %v370_v63, %v275_v52  ;;  %v380_v2 = vadd.f32 %v379_v0, %v290_v62 }
  0xb5   : > { %391 = vst.msk [vmem:[%s704_s25 + $0x40] sm:$0xff] %vm382_vm1, %v371_v1 }
  0xb6   : > { %394 = vst.msk [vmem:[%s704_s25 + $0x58] sm:$0xff] %vm382_vm1, %v380_v2 }
  0xb7 PF: > { %s13_s14 = sadd.s32 1, %s569_s14   ;;  %s743_s12 = smov %s565_s13 }
  0xb8   : > { %p10_p5 = scmp.ge.s32.totalorder %s13_s14, 4   ;;  %s744_s13 = smov %s746_s15 }
  0xba   :  { %12 = sbr.rel (!%p10_p5) target bundleno = 2 (0x2), region = 62 }

</bundles_post_ra>
